<compile_context>
chip_gen: v7x
topology: tpu7x:2x2x1
jax: 0.10.0
libtpu: 0.0.40
codegen_flags: <defaults>
</compile_context>

<pallas_src>
import functools

import jax
import jax.numpy as jnp
from jax.experimental import pallas as pl
from jax.experimental.pallas import tpu as pltpu


# ----------------------------- Pallas kernel ------------------------------- #

def _add_pe_kernel(x_ref, pe_ref, o_ref):
    """Fused element-wise add: (B, ts, D) + (ts, D) broadcast over batch."""
    o_ref[...] = x_ref[...] + pe_ref[...]


# ------------------------------- buffers ------------------------------------ #

def make_positional_encoding(d_model, max_len=5000, dtype=jnp.float32):
    """Same construction as the PyTorch __init__ (sin on even, cos on odd dims)."""
    position = jnp.arange(max_len, dtype=jnp.float32)[:, None]            # (L, 1)
    div_term = jnp.exp(jnp.arange(0, d_model, 2, dtype=jnp.float32)
                       * (-jnp.log(jnp.float32(10000.0)) / d_model))      # (D/2,)
    ang = position * div_term[None, :]                                    # (L, D/2)
    pe = jnp.zeros((max_len, d_model), jnp.float32)
    pe = pe.at[:, 0::2].set(jnp.sin(ang))
    pe = pe.at[:, 1::2].set(jnp.cos(ang))
    return pe.astype(dtype)                                               # (L, D)


# -------------------------------- wrapper ----------------------------------- #

def _round_up(n, m):
    return ((n + m - 1) // m) * m


@functools.partial(jax.jit, static_argnames=("target_block_bytes",))
def positional_encoding_forward(x, pe, target_block_bytes=1 << 20):
    """x: (B, S, D);  pe: (max_len, D)  ->  x + pe[None, :S, :]."""
    B, S, D = x.shape
    itemsize = jnp.dtype(x.dtype).itemsize
    pe = pe.astype(x.dtype)                      # keep add/store in x's dtype

    # Rows per tile so each x/out buffer is ~target_block_bytes (HBM-bound add:
    # bigger contiguous DMAs -> closer to roofline). Multiple of 8 for (8,128).
    ts = max(8, target_block_bytes // (B * D * itemsize))
    ts = min(_round_up(ts, 8), _round_up(S, 8))
    # Keep >= 2 blocks on the parallel axis so both v7x TensorCores get work.
    if S > 8 and ts >= S:
        ts = _round_up(pl.cdiv(S, 2), 8)
    grid = (pl.cdiv(S, ts),)                     # final partial block is padded/masked

    return pl.pallas_call(
        _add_pe_kernel,
        out_shape=jax.ShapeDtypeStruct((B, S, D), x.dtype),
        grid=grid,
        in_specs=[
            pl.BlockSpec((B, ts, D), lambda s: (0, s, 0)),   # whole batch per step
            pl.BlockSpec((ts, D), lambda s: (s, 0)),         # pe tile, no pre-slice
        ],
        out_specs=pl.BlockSpec((B, ts, D), lambda s: (0, s, 0)),
        compiler_params=pltpu.CompilerParams(
            dimension_semantics=("parallel",)),
    )(x, pe)


# --------------------------- pure-JAX reference ----------------------------- #

def reference_forward(x, pe):
    S = x.shape[1]
    return x + pe.astype(x.dtype)[None, :S, :]


# ---------------------------------- main ------------------------------------ #

if __name__ == "__main__":
    B, S, D = 2, 64, 128          # (batch, seq_len, d_model) — small, lane-aligned
    MAX_LEN = 5000

    key = jax.random.PRNGKey(0)
    x = jax.random.normal(key, (B, S, D), jnp.float32)
    pe = make_positional_encoding(D, max_len=MAX_LEN)

    out = positional_encoding_forward(x, pe)
    out = jax.block_until_ready(out)

    ref = reference_forward(x, pe)

    assert out.shape == (B, S, D), out.shape
    assert jnp.all(jnp.isfinite(out))
    assert jnp.allclose(out, ref, atol=1e-6, rtol=1e-6), \
        float(jnp.max(jnp.abs(out - ref)))

    # Also exercise a ragged / larger sequence length to cover the cdiv path.
    S2 = 200
    x2 = jax.random.normal(jax.random.PRNGKey(1), (B, S2, D), jnp.float32)
    out2 = jax.block_until_ready(positional_encoding_forward(x2, pe))
    assert jnp.allclose(out2, reference_forward(x2, pe), atol=1e-6, rtol=1e-6)

    print("KERNEL_OK")
</pallas_src>

<mosaic_0001>
module attributes {stable_mosaic.version = 11 : i64} {
  func.func @_add_pe_kernel(%arg0: i32, %arg1: memref<2x32x128xf32, #tpu.memory_space<vmem>>, %arg2: memref<32x128xf32, #tpu.memory_space<vmem>>, %arg3: memref<2x32x128xf32, #tpu.memory_space<vmem>>) attributes {dimension_semantics = [#tpu.dimension_semantics<parallel>], iteration_bounds = array<i64: 2>, scalar_prefetch = 0 : i64, scratch_operands = 0 : i64, tpu.core_type = #tpu.core_type<tc>, window_params = [{transform_indices = @transform_0, window_bounds = array<i64: 2, 32, 128>}, {transform_indices = @transform_1, window_bounds = array<i64: 32, 128>}, {transform_indices = @transform_2, window_bounds = array<i64: 2, 32, 128>}]} {
    %c0 = arith.constant 0 : index
    %c0_0 = arith.constant 0 : index
    %c0_1 = arith.constant 0 : index
    %0 = vector.load %arg1[%c0, %c0_0, %c0_1] : memref<2x32x128xf32, #tpu.memory_space<vmem>>, vector<2x32x128xf32>
    %c0_2 = arith.constant 0 : index
    %c0_3 = arith.constant 0 : index
    %1 = vector.load %arg2[%c0_2, %c0_3] : memref<32x128xf32, #tpu.memory_space<vmem>>, vector<32x128xf32>
    %2 = vector.shape_cast %1 : vector<32x128xf32> to vector<1x32x128xf32>
    %3 = vector.broadcast %2 : vector<1x32x128xf32> to vector<2x32x128xf32>
    %4 = arith.addf %0, %3 : vector<2x32x128xf32>
    %c0_4 = arith.constant 0 : index
    %c0_5 = arith.constant 0 : index
    %c0_6 = arith.constant 0 : index
    %5 = vector.load %arg3[%c0_4, %c0_5, %c0_6] : memref<2x32x128xf32, #tpu.memory_space<vmem>>, vector<2x32x128xf32>
    tpu.vector_store %arg3[%c0_4, %c0_5, %c0_6], %4 {strides = array<i32>} : memref<2x32x128xf32, #tpu.memory_space<vmem>>, vector<2x32x128xf32>,
    return
  }
  func.func @transform_0(%arg0: i32) -> (i32, i32, i32) {
    %c0_i32 = arith.constant 0 : i32
    %c0_i32_0 = arith.constant 0 : i32
    %c0_i32_1 = arith.constant 0 : i32
    return %c0_i32, %arg0, %c0_i32_0 : i32, i32, i32
  }
  func.func @transform_1(%arg0: i32) -> (i32, i32) {
    %c0_i32 = arith.constant 0 : i32
    %c0_i32_0 = arith.constant 0 : i32
    return %arg0, %c0_i32 : i32, i32
  }
  func.func @transform_2(%arg0: i32) -> (i32, i32, i32) {
    %c0_i32 = arith.constant 0 : i32
    %c0_i32_0 = arith.constant 0 : i32
    %c0_i32_1 = arith.constant 0 : i32
    return %c0_i32, %arg0, %c0_i32_0 : i32, i32, i32
  }
}

</mosaic_0001>

<bundles_post_ra>
// kernel: positional_encoding_forward.1
= control target key start
LH: loop header
LB: loop body
LE: loop exit
PB: predicated region body
PF: predicated region fallthrough
CT: control target
= control target key end

     0   :  { %7 = vsyncpa [#allocation3], 0  ;;  %s793_s0 = inlined_call_operand.hbm [shape: f32[2,64,128], index: 0, kind: input, shape index: {}]   ;;  %s794_s1 = inlined_call_operand.hbm [shape: f32[5000,128], index: 1, kind: input, shape index: {}]   ;;  %s795_s2 = inlined_call_operand.hbm [shape: f32[2,64,128], index: 2, kind: output, shape index: {}]  }
   0x1   :  { %9 = vsyncpa [#allocation3 + $0x1], 0 }
   0x2   :  { %10 = vsyncpa [#allocation6], 0 }
   0x3   :  { %12 = vsyncpa [#allocation6 + $0x1], 0 }
   0x4   :  { %13 = vsyncpa [#allocation4], 0 }
   0x5   :  { %15 = vsyncpa [#allocation4 + $0x1], 0  ;;  %s607_s9 = smov 0   ;;  %s609_s10 = smov 0  }
   0x6   :  { %s611_s11 = smov 0   ;;  %s613_s12 = smov 0  }
   0x7 LB: > { %s628_s13 = sadd.s32 4294967295, %s574_s12   ;;  %s407_s14 = sadd.s32 4294967294, %s574_s12   ;;  %s574_s12 = sphi %s613_s12, %s806_s12   ;;  %s570_s11 = sphi %s611_s11, %s805_s11   ;;  %s566_s10 = sphi %s609_s10, %s804_s10   ;;  %s562_s9 = sphi %s607_s9, %s803_s9  }
   0x8   : > { %s632_s15 = sadd.s32 1, %s574_s12   ;;  %s28_s16 = sadd.s32 1, %s570_s11 }
   0x9   : > { %s25_s17 = ssub.s32 %s574_s12, %s632_s15  ;;  %p35_p0 = scmp.ne.s32.totalorder %s570_s11, %s566_s10 }
   0xa   : > { %p26_p1 = scmp.eq.s32.totalorder %s25_s17, 0  ;;  %p36_p2 = scmp.eq.s32.totalorder %s574_s12, 0 }
   0xb   : > { %p41_p3 = scmp.ne.s32.totalorder %s566_s10, %s562_s9  ;;  %p42_p4 = scmp.eq.s32.totalorder %s628_s13, 0 }
   0xc   : > { %s644_s18 = scalar_select %p26_p1, %s570_s11, %s28_s16  }
   0xd   : > { %p646_p5 = por %p36_p2, %p35_p0  ;;  %p650_p6 = por %p42_p4, %p41_p3 }
   0xe   : > { %p91_p7 = scmp.eq.s32.totalorder %s628_s13, 1  ;;  %p97_p8 = scmp.eq.s32.totalorder %s407_s14, 1 }
   0xf   : > { %p796_p11 = scmp.ge.s32.totalorder %s574_s12, 2 }
  0x10   : > { %p655_p9 = por %p91_p7, %p35_p0  ;;  %p659_p10 = por %p97_p8, %p41_p3 }
  0x11   : > { %113 = sbr.rel (%p796_p11) target bundleno = 71 (0x47), region = 16 }
  0x12   : > { %s800_s22 = scalar_select %p659_p10, 1, 0 }
  0x18   : > { %s667_s23 = sand.u32 1, %s570_s11   ;;  %s431_s24 = sshll.u32 %s574_s12, 9 }
  0x19   : > { %s410_s25 = sshll.u32 %s667_s23, 6  ;;  %s127_s28 = scalar_lea.hbm %s793_s0, %s431_s24 }
  0x1a   : > { %s434_s29 = scalar_select %p646_p5, [#allocation0], [#allocation12] }
  0x1b   : > { %s121_s30 = scalar_lea.vmem [#allocation2], %s410_s25  ;;  %s576_s5 = smov 1024  }
  0x1c   : > { %s140_s3 = sshll.u32 %s121_s30, 4  ;;  %s132_s4 = sld [smem:[%s434_s29]]   ;;  %s141_s3 = int_to_ptr.vmem [resolvable:$true] %s140_s3 }
  0x1d   : > { %435 = sst [smem:[#allocation9]] (%p646_p5), %s576_s5  ;;  %s577_s6 = smov 512  }
  0x1e   : > { %436 = sst [smem:[#allocation9 + $0x1]] (%p646_p5), %s577_s6  ;;  %s578_s7 = smov 4  }
  0x1f   : > { %437 = sst [smem:[#allocation9 + $0x2]] (%p646_p5), %s578_s7  ;;  %s579_s8 = smov 128  }
  0x20   : > { %438 = sst [smem:[#allocation9 + $0x3]] (%p646_p5), %s579_s8  ;;  %s580_s16 = smov 8  }
  0x21   : > { %439 = sst [smem:[#allocation9 + $0x4]] (%p646_p5), %s579_s8  ;;  %s118_s25 = scalar_lea.sflag [#allocation3], %s667_s23 }
  0x22   : > { %s413_s14 = sshll.u32 %s132_s4, 26  ;;  %440 = sst [smem:[#allocation9 + $0x5]] (%p646_p5), %s580_s16 }
  0x23   : > { %s414_s17 = sadd.s32 134217728, %s413_s14  ;;  %s581_s26 = smov [#allocation8]  }
  0x24   : > { %441 = dma.general (%p646_p5), %s127_s28, 1024, %s141_s3, %s118_s25, %s581_s26, [#allocation9], %s414_s17, 0  }
  0x25   : > { %162 = sbr.rel (!%p646_p5) target bundleno = 71 (0x47), region = 24  ;;  %s415_s27 = sshll.u32 (%p646_p5), %s667_s23, 5 }
  0x26   : > { %s416_s29 = sshll.u32 (%p646_p5), %s574_s12, 2  ;;  %s164_s6 = scalar_lea.sflag (%p646_p5), [#allocation6], %s667_s23 }
  0x27   : > { %s169_s30 = ssub.s32 (%p646_p5), 625, %s416_s29  ;;  %s167_s7 = scalar_lea.vmem (%p646_p5), [#allocation5], %s415_s27 }
  0x28   : > { %p170_p12 = scmp.lt.s32.totalorder (%p646_p5), %s169_s30, 4 }
  0x2c   : > { %s808_s30 = smov (!%p170_p12, %s169_s30), 4 }
  0x2d   : > { %s697_s4 = sshll.u32 %s808_s30, 7 }
  0x2e   : > { %s174_s5 = ssub.s32 512, %s697_s4 }
  0x2f   : > { %175 = vsyncadd %s164_s6, %s174_s5  ;;  %p418_p13 = scmp.ne.s32.totalorder %s697_s4, 0  ;;  %s709_s3 = scalar_lea.hbm %s794_s1, %s431_s24 }
  0x30   : > { %s180_s8 = sshll.u32 %s167_s7, 4  ;;  %s504_s14 = scalar_lea.hbm %s709_s3, %s697_s4  ;;  %s711_s8 = int_to_ptr.vmem [resolvable:$true] %s180_s8 }
  0x31   : > { %p505_p0 = scmp.ne.s32.totalorder %s709_s3, %s504_s14  ;;  %s508_s25 = scalar_lea.hbm %s794_s1, 80000 }
  0x32   : > { %p509_p3 = scmp.lt.u32.totalorder %s709_s3, %s794_s1  ;;  %p510_p4 = scmp.lt.u32.totalorder %s508_s25, %s504_s14 }
  0x33   : > { %p506_p1 = pnand %p505_p0, %p418_p13  ;;  %p512_p7 = scmp.lt.u32.totalorder %s504_s14, %s709_s3 }
  0x34   : > { %p511_p5 = por %p510_p4, %p509_p3 }
  0x35   : > { %p507_p2 = pneg %p506_p1 }
  0x36   : > { %p513_p8 = por %p512_p7, %p511_p5 }
  0x38   : > { %p514_p12 = pnand %p513_p8, %p507_p2 }
  0x3a   : > { %517 = shalt.err (!%p514_p12)
}
  0x3b   : > { %s518_s24 = scalar_lea.vmem %s711_s8, %s697_s4  ;;  %s582_s29 = smov [#allocation5]  }
  0x3c   : > { %p519_p0 = scmp.ne.s32.totalorder %s711_s8, %s518_s24  ;;  %s522_s30 = sshll.u32 %s582_s29, 4  ;;  %s523_s30 = int_to_ptr.vmem [resolvable:$false] %s522_s30 }
  0x3d   : > { %s524_s5 = scalar_lea.vmem %s523_s30, 1024  ;;  %p525_p10 = scmp.lt.s32.totalorder %s711_s8, %s523_s30 }
  0x3e   : > { %p520_p1 = pnand %p519_p0, %p418_p13  ;;  %p526_p3 = scmp.lt.s32.totalorder %s524_s5, %s518_s24 }
  0x40   : > { %p521_p11 = pneg %p520_p1  ;;  %p527_p4 = por %p526_p3, %p525_p10 }
  0x42   : > { %p528_p5 = pnand %p527_p4, %p521_p11 }
  0x44   : > { %531 = shalt.err (!%p528_p5)
}
  0x45   : > { %s583_s7 = smov 128   ;;  %s584_s19 = smov 8  }
  0x46   : > { %186 = dma.hbm_to_vmem [thread:$0]  (%p418_p13), %s709_s3, %s697_s4, %s711_s8, %s164_s6, %s583_s7, %s583_s7, %s584_s19  }
  0x47 PF: > { %p422_p2 = scmp.ge.s32.totalorder %s574_s12, 1  ;;  %p188_p7 = scmp.lt.s32.totalorder %s574_s12, 3 }
  0x49   : > { %p189_p8 = pnand %p422_p2, %p188_p7 }
  0x4a   : > { %s742_s28 = sand.u32 (!%p189_p8), 1, %s566_s10  }
  0x4b   : > { %192 = sbr.rel (%p189_p8) target bundleno = 103 (0x67), region = 28  ;;  %s423_s14 = sshll.u32 (!%p189_p8), %s742_s28, 6 }
  0x4c   : > { %s195_s16 = scalar_lea.sflag (!%p189_p8), [#allocation3], %s742_s28  ;;  %s198_s17 = scalar_lea.vmem (!%p189_p8), [#allocation2], %s423_s14 }
  0x52   : > { %549 = dma.done.wait (%p650_p6), %s195_s16, 1024  }
  0x53   : > { %551 = vsyncadd (%p650_p6), %s195_s16, 4294966272  ;;  %s424_s23 = sshll.u32 %s742_s28, 5  ;;  %s204_s4 = scalar_lea.sflag [#allocation6], %s742_s28 }
  0x54   : > { %s207_s6 = scalar_lea.vmem [#allocation5], %s424_s23 }
  0x55   : > { %553 = dma.done.wait (%p650_p6), %s204_s4, 512  }
  0x56   : > { %555 = vsyncadd (%p650_p6), %s204_s4, 4294966784  ;;  %v240_v0 = vld [vmem:[%s198_s17] sm:$0xff]  ;;  %v241_v2 = vld [vmem:[%s198_s17 + $0x8] sm:$0xff]  ;;  %s232_s3 = scalar_lea.vmem [#allocation7], %s423_s14  ;;  %s269_s20 = scalar_lea.sflag [#allocation4], %s742_s28 }
  0x57   : > { %v248_v1 = vld [vmem:[%s207_s6] sm:$0xff]  ;;  %v249_v4 = vld [vmem:[%s207_s6 + $0x8] sm:$0xff]  ;;  %v242_v5 = vld [vmem:[%s198_s17 + $0x10] sm:$0xff] }
  0x58   : > { %v252_v3 = vadd.f32 %v248_v1, %v240_v0  ;;  %v250_v6 = vld [vmem:[%s207_s6 + $0x10] sm:$0xff]  ;;  %v253_v7 = vadd.f32 %v249_v4, %v241_v2  ;;  %v243_v9 = vld [vmem:[%s198_s17 + $0x18] sm:$0xff]  ;;  %v244_v11 = vld [vmem:[%s198_s17 + $0x20] sm:$0xff] }
  0x59   : > { %v254_v8 = vadd.f32 %v250_v6, %v242_v5  ;;  %v251_v10 = vld [vmem:[%s207_s6 + $0x18] sm:$0xff]  ;;  %v256_v13 = vadd.f32 %v248_v1, %v244_v11  ;;  %v245_v14 = vld [vmem:[%s198_s17 + $0x28] sm:$0xff]  ;;  %v246_v15 = vld [vmem:[%s198_s17 + $0x30] sm:$0xff] }
  0x5a   : > { %260 = vst [vmem:[%s232_s3] sm:$0xff] %v252_v3  ;;  %v255_v12 = vadd.f32 %v251_v10, %v243_v9  ;;  %v247_v16 = vld [vmem:[%s198_s17 + $0x38] sm:$0xff]  ;;  %261 = vst [vmem:[%s232_s3 + $0x8] sm:$0xff] %v253_v7  ;;  %v257_v17 = vadd.f32 %v249_v4, %v245_v14  ;;  %v258_v18 = vadd.f32 %v250_v6, %v246_v15 }
  0x5b   : > { %262 = vst [vmem:[%s232_s3 + $0x10] sm:$0xff] %v254_v8  ;;  %v259_v19 = vadd.f32 %v251_v10, %v247_v16  ;;  %264 = vst [vmem:[%s232_s3 + $0x20] sm:$0xff] %v256_v13 }
  0x5c   : > { %263 = vst [vmem:[%s232_s3 + $0x18] sm:$0xff] %v255_v12  ;;  %265 = vst [vmem:[%s232_s3 + $0x28] sm:$0xff] %v257_v17 }
  0x5d   : > { %266 = vst [vmem:[%s232_s3 + $0x30] sm:$0xff] %v258_v18  ;;  %267 = vst [vmem:[%s232_s3 + $0x38] sm:$0xff] %v259_v19 }
  0x5e   : > { %s433_s8 = sshll.u32 %s628_s13, 9  ;;  %s298_s25 = sshll.u32 %s232_s3, 4  ;;  %s299_s25 = int_to_ptr.vmem [resolvable:$true] %s298_s25 }
  0x5f   : > { %s281_s24 = scalar_lea.hbm %s795_s2, %s433_s8  ;;  %s585_s29 = smov 512  }
  0x60   : > { %444 = sst [smem:[#allocation11]] (%p655_p9), %s585_s29  ;;  %s586_s30 = smov 1024  }
  0x61   : > { %445 = sst [smem:[#allocation11 + $0x1]] (%p655_p9), %s586_s30  ;;  %s587_s5 = smov 4  }
  0x62   : > { %446 = sst [smem:[#allocation11 + $0x2]] (%p655_p9), %s587_s5  ;;  %s588_s7 = smov 128  }
  0x63   : > { %447 = sst [smem:[#allocation11 + $0x3]] (%p655_p9), %s588_s7  ;;  %s589_s13 = smov 8  }
  0x64   : > { %448 = sst [smem:[#allocation11 + $0x4]] (%p655_p9), %s588_s7  ;;  %s590_s19 = smov [#allocation10]  }
  0x65   : > { %449 = sst [smem:[#allocation11 + $0x5]] (%p655_p9), %s589_s13  ;;  %s591_s28 = smov 0  }
  0x66   : > { %450 = dma.general (%p655_p9), %s299_s25, 1024, %s281_s24, %s269_s20, %s590_s19, [#allocation11], %s591_s28, 0  }
  0x67 PF: > { %s326_s14 = sand.u32 1, %s562_s9   ;;  %p801_p6 = scmp.ne.s32.totalorder %s800_s22, 0 }
  0x68   : > { %p802_p10 = scmp.ge.s32.totalorder %s574_s12, 2  ;;  %s327_s16 = scalar_lea.sflag [#allocation4], %s326_s14 }
  0x6a   : > { %p453_p11 = pnand %p802_p10, %p801_p6 }
  0x6c   : > { %557 = dma.done.wait (!%p453_p11), %s327_s16, 1024  }
  0x6d   : > { %559 = vsyncadd (!%p453_p11), %s327_s16, 4294966272  ;;  %p18_p13 = scmp.ge.s32.totalorder %s632_s15, 4   ;;  %s803_s9 = smov %s566_s10 }
  0x6e   : > { %s804_s10 = smov %s570_s11  ;;  %s805_s11 = smov %s644_s18 }
  0x6f   : > { %s806_s12 = smov %s632_s15  ;;  %20 = sbr.rel (!%p18_p13) target bundleno = 7 (0x7), region = 96 }
  0x76   :  { %332 = vsyncpa [#allocation3], 1 }
  0x77   :  { %334 = vsyncpa [#allocation3 + $0x1], 1 }
  0x78   :  { %335 = vsyncpa [#allocation6], 1 }
  0x79   :  { %337 = vsyncpa [#allocation6 + $0x1], 1 }
  0x7a   :  { %338 = vsyncpa [#allocation4], 1 }
  0x7b   :  { %340 = vsyncpa [#allocation4 + $0x1], 1 }

</bundles_post_ra>
